<compile_context>
chip_gen: v5e
topology: v5e:2x2
jax: 0.10.0
libtpu: 0.0.40
codegen_flags: <defaults>
</compile_context>

<pallas_src>
import math
import jax
import jax.numpy as jnp
from jax.experimental import pallas as pl
from jax.experimental.pallas import tpu as pltpu


# ---------------------------------------------------------------------------
# Kernels
# ---------------------------------------------------------------------------
def _make_cell_kernel(non_linearity):
    """Single fused matmul + activation: out = act(lhs @ rhs)."""
    if non_linearity == "tanh":
        act = jnp.tanh
    else:
        act = lambda v: jnp.maximum(v, 0.0)

    def kernel(lhs_ref, rhs_ref, out_ref):
        a = jnp.dot(lhs_ref[...], rhs_ref[...],
                    preferred_element_type=jnp.float32)
        out_ref[...] = act(a).astype(out_ref.dtype)

    return kernel


def _make_seq_kernel(non_linearity):
    """Sequential recurrence over the time grid axis.

    a_ref:  (1, B, H)  precomputed x[t] @ W.T for this timestep
    ut_ref: (H, H)     U.T, VMEM resident (constant index_map)
    h0_ref: (B, H)     initial hidden state
    out_ref:(1, B, H)  per-step output
    h_scr:  (B, H) f32 VMEM scratch carrying the hidden state across steps
    """
    if non_linearity == "tanh":
        act = jnp.tanh
    else:
        act = lambda v: jnp.maximum(v, 0.0)

    def kernel(a_ref, ut_ref, h0_ref, out_ref, h_scr):
        t = pl.program_id(0)

        @pl.when(t == 0)
        def _():
            h_scr[...] = h0_ref[...].astype(jnp.float32)

        a = a_ref[0].astype(jnp.float32) + jnp.dot(
            h_scr[...], ut_ref[...], preferred_element_type=jnp.float32)
        h_new = act(a)
        h_scr[...] = h_new
        out_ref[0] = h_new.astype(out_ref.dtype)

    return kernel


# ---------------------------------------------------------------------------
# Wrappers
# ---------------------------------------------------------------------------
def rnn_forward(x, W, U, b_prev=None, non_linearity="tanh"):
    """Single RNN step, matching RNN.forward of the PyTorch module."""
    B, in_features = x.shape
    out_features = W.shape[0]
    assert W.shape == (out_features, in_features)
    assert U.shape == (out_features, out_features)

    if b_prev is None:
        # Specialized path: no zeros buffer, no U matmul.
        lhs = x                                   # (B, in)
        rhs = W.T                                 # (in, out)
    else:
        # Fuse both matmuls into one MXU pass: [x | h] @ [W ; U].T
        lhs = jnp.concatenate([x, b_prev], axis=1)          # (B, in+out)
        rhs = jnp.concatenate([W, U], axis=1).T             # (in+out, out)

    K = lhs.shape[1]
    kernel = _make_cell_kernel(non_linearity)

    flops = 2 * B * K * out_features
    trans = B * out_features if non_linearity == "tanh" else 0
    bytes_acc = 4 * (B * K + K * out_features + B * out_features)

    return pl.pallas_call(
        kernel,
        out_shape=jax.ShapeDtypeStruct((B, out_features), x.dtype),
        grid_spec=pltpu.PrefetchScalarGridSpec(
            num_scalar_prefetch=0,
            grid=(1,),
            in_specs=[
                pl.BlockSpec((B, K), lambda i: (0, 0)),
                pl.BlockSpec((K, out_features), lambda i: (0, 0)),
            ],
            out_specs=pl.BlockSpec((B, out_features), lambda i: (0, 0)),
        ),
        compiler_params=pltpu.CompilerParams(
            dimension_semantics=("arbitrary",)),
        cost_estimate=pl.CostEstimate(
            flops=flops, transcendentals=trans, bytes_accessed=bytes_acc),
    )(lhs, rhs)


def rnn_sequence_forward(x_seq, W, U, h0=None, non_linearity="tanh"):
    """Apply the RNN cell over a whole sequence in ONE pallas_call.

    x_seq: (T, B, in_features)
    Returns all hidden states: (T, B, out_features).
    """
    T, B, in_features = x_seq.shape
    out_features = W.shape[0]
    assert W.shape == (out_features, in_features)
    assert U.shape == (out_features, out_features)

    # Transpose weights ONCE for the whole sequence (not per step).
    Wt = W.T                                        # (in, out)
    Ut = U.T                                        # (out, out)

    # Hoist the time-parallel input projection out of the recurrence:
    # one large matmul over all timesteps (plain XLA, full MXU utilization).
    A = jnp.einsum("tbi,io->tbo", x_seq, Wt).astype(jnp.float32)  # (T, B, out)

    if h0 is None:
        h0 = jnp.zeros((B, out_features), dtype=jnp.float32)
    else:
        h0 = h0.astype(jnp.float32)

    kernel = _make_seq_kernel(non_linearity)

    flops = 2 * T * B * out_features * out_features
    trans = T * B * out_features if non_linearity == "tanh" else 0
    bytes_acc = 4 * (T * B * out_features * 2
                     + out_features * out_features
                     + B * out_features)

    return pl.pallas_call(
        kernel,
        out_shape=jax.ShapeDtypeStruct((T, B, out_features), x_seq.dtype),
        grid_spec=pltpu.PrefetchScalarGridSpec(
            num_scalar_prefetch=0,
            grid=(T,),
            in_specs=[
                # A[t]: one (B, out) slab per grid step.
                pl.BlockSpec((1, B, out_features), lambda t: (t, 0, 0)),
                # U.T: constant index_map -> DMA'd once, VMEM resident.
                pl.BlockSpec((out_features, out_features), lambda t: (0, 0)),
                # h0: constant index_map, read only at t == 0.
                pl.BlockSpec((B, out_features), lambda t: (0, 0)),
            ],
            out_specs=pl.BlockSpec((1, B, out_features), lambda t: (t, 0, 0)),
            scratch_shapes=[pltpu.VMEM((B, out_features), jnp.float32)],
        ),
        # Time axis carries the hidden state -> must stay "arbitrary".
        compiler_params=pltpu.CompilerParams(
            dimension_semantics=("arbitrary",)),
        cost_estimate=pl.CostEstimate(
            flops=flops, transcendentals=trans, bytes_accessed=bytes_acc),
    )(A, Ut, h0)


# ---------------------------------------------------------------------------
# Params init (mirrors the PyTorch module)
# ---------------------------------------------------------------------------
def init_rnn_params(key, in_features, out_features, dtype=jnp.float32):
    """W, U ~ Uniform(-sqrt(1/out_features), sqrt(1/out_features))."""
    bound = math.sqrt(1.0 / out_features)
    kw, ku = jax.random.split(key)
    W = jax.random.uniform(kw, (out_features, in_features), dtype,
                           minval=-bound, maxval=bound)
    U = jax.random.uniform(ku, (out_features, out_features), dtype,
                           minval=-bound, maxval=bound)
    return W, U


# ---------------------------------------------------------------------------
# Demo / correctness check
# ---------------------------------------------------------------------------
if __name__ == "__main__":
    key = jax.random.PRNGKey(0)
    k_x, k_b, k_s, k_p = jax.random.split(key, 4)

    B = 8              # multiple of 8 sublanes
    in_features = 32
    out_features = 128  # lane-dense output (multiple of 128)
    T = 8               # sequence length for the fused kernel

    x = jax.random.normal(k_x, (B, in_features), jnp.float32)
    b_prev = jax.random.normal(k_b, (B, out_features), jnp.float32)
    x_seq = jax.random.normal(k_s, (T, B, in_features), jnp.float32)
    W, U = init_rnn_params(k_p, in_features, out_features)

    # --- single-step paths -------------------------------------------------
    out = rnn_forward(x, W, U, b_prev, non_linearity="tanh")
    out0 = rnn_forward(x, W, U, None, non_linearity="tanh")
    out_relu = rnn_forward(x, W, U, b_prev, non_linearity="relu")
    jax.block_until_ready((out, out0, out_relu))

    ref = jnp.tanh(x @ W.T + b_prev @ U.T)
    ref0 = jnp.tanh(x @ W.T)
    ref_relu = jnp.maximum(x @ W.T + b_prev @ U.T, 0.0)

    assert out.shape == (B, out_features)
    assert jnp.allclose(out, ref, atol=1e-4, rtol=1e-4)
    assert jnp.allclose(out0, ref0, atol=1e-4, rtol=1e-4)
    assert jnp.allclose(out_relu, ref_relu, atol=1e-4, rtol=1e-4)

    # --- fused sequence path -----------------------------------------------
    hs = rnn_sequence_forward(x_seq, W, U, h0=None, non_linearity="tanh")
    jax.block_until_ready(hs)

    h = jnp.zeros((B, out_features), jnp.float32)
    ref_steps = []
    for t in range(T):
        h = jnp.tanh(x_seq[t] @ W.T + h @ U.T)
        ref_steps.append(h)
    ref_seq = jnp.stack(ref_steps)

    assert hs.shape == (T, B, out_features)
    assert jnp.allclose(hs, ref_seq, atol=1e-4, rtol=1e-4)

    print("KERNEL_OK")
</pallas_src>

<mosaic_0001>
module attributes {stable_mosaic.version = 11 : i64} {
  func.func @kernel(%arg0: i32, %arg1: memref<8x160xf32, #tpu.memory_space<vmem>>, %arg2: memref<160x128xf32, #tpu.memory_space<vmem>>, %arg3: memref<8x128xf32, #tpu.memory_space<vmem>>) attributes {dimension_semantics = [#tpu.dimension_semantics<arbitrary>], iteration_bounds = array<i64: 1>, scalar_prefetch = 0 : i64, scratch_operands = 0 : i64, tpu.core_type = #tpu.core_type<tc>, window_params = [{pipeline_mode = #tpu.pipeline_mode<synchronous>, transform_indices = @transform_0, window_bounds = array<i64: 8, 160>}, {pipeline_mode = #tpu.pipeline_mode<synchronous>, transform_indices = @transform_1, window_bounds = array<i64: 160, 128>}, {pipeline_mode = #tpu.pipeline_mode<synchronous>, transform_indices = @transform_2, window_bounds = array<i64: 8, 128>}]} {
    %c0 = arith.constant 0 : index
    %c0_0 = arith.constant 0 : index
    %0 = vector.load %arg1[%c0, %c0_0] : memref<8x160xf32, #tpu.memory_space<vmem>>, vector<8x160xf32>
    %c0_1 = arith.constant 0 : index
    %c0_2 = arith.constant 0 : index
    %1 = vector.load %arg2[%c0_1, %c0_2] : memref<160x128xf32, #tpu.memory_space<vmem>>, vector<160x128xf32>
    %cst = arith.constant dense<0.000000e+00> : vector<8x128xf32>
    %2 = tpu.matmul %0, %1, %cst {dimension_numbers = #tpu.dot_dimension_numbers<[1], [0], [0], [1], [0, 0, 1, 1], [], []>} : vector<8x160xf32>, vector<160x128xf32>, vector<8x128xf32> -> vector<8x128xf32>
    %3 = math.tanh %2 : vector<8x128xf32>
    %c0_3 = arith.constant 0 : index
    %c0_4 = arith.constant 0 : index
    %4 = vector.load %arg3[%c0_3, %c0_4] : memref<8x128xf32, #tpu.memory_space<vmem>>, vector<8x128xf32>
    tpu.vector_store %arg3[%c0_3, %c0_4], %3 {strides = array<i32>} : memref<8x128xf32, #tpu.memory_space<vmem>>, vector<8x128xf32>,
    return
  }
  func.func @transform_0(%arg0: i32) -> (i32, i32) {
    %c0_i32 = arith.constant 0 : i32
    %c0_i32_0 = arith.constant 0 : i32
    %c0_i32_1 = arith.constant 0 : i32
    return %c0_i32, %c0_i32_0 : i32, i32
  }
  func.func @transform_1(%arg0: i32) -> (i32, i32) {
    %c0_i32 = arith.constant 0 : i32
    %c0_i32_0 = arith.constant 0 : i32
    %c0_i32_1 = arith.constant 0 : i32
    return %c0_i32, %c0_i32_0 : i32, i32
  }
  func.func @transform_2(%arg0: i32) -> (i32, i32) {
    %c0_i32 = arith.constant 0 : i32
    %c0_i32_0 = arith.constant 0 : i32
    %c0_i32_1 = arith.constant 0 : i32
    return %c0_i32, %c0_i32_0 : i32, i32
  }
}

</mosaic_0001>

<bundles_post_ra>
// kernel: tpu_custom_call.1
= control target key start
LH: loop header
LB: loop body
LE: loop exit
PB: predicated region body
PF: predicated region fallthrough
CT: control target
= control target key end

     0   :  { %7 = vsyncpa [#allocation3], 0  ;;  %s243_s0 = inlined_call_operand.hbm [shape: f32[8,160], index: 0, kind: input, shape index: {}]   ;;  %s244_s1 = inlined_call_operand.hbm [shape: f32[160,128], index: 1, kind: input, shape index: {}]   ;;  %s245_s2 = inlined_call_operand.hbm [shape: f32[8,128], index: 2, kind: output, shape index: {}]  }
   0x1   :  { %8 = vsyncpa [#allocation6], 0 }
   0x2   :  { %9 = vsyncpa [#allocation4], 0  ;;  %s15_s11 = sshll.u32 %s243_s0, 4  ;;  %s214_s12 = smov [#allocation2]   ;;  %s16_s11 = int_to_ptr.hbm [resolvable:$true] %s15_s11 }
   0x3   :  { %s17_s13 = sshll.u32 %s214_s12, 4  ;;  %s25_s16 = sshll.u32 %s244_s1, 4  ;;  %s18_s13 = int_to_ptr.vmem [resolvable:$true] %s17_s13  ;;  %s26_s16 = int_to_ptr.hbm [resolvable:$true] %s25_s16 }
   0x4   :  { %20 = dma.hbm_to_vmem [thread:$0]  %s16_s11, 256, %s18_s13, [#allocation3]  }
   0x5   :  { %s215_s17 = smov [#allocation5]   ;;  %s216_s19 = smov 128  }
   0x6   :  { %s27_s18 = sshll.u32 %s215_s17, 4  ;;  %s217_s20 = smov 8   ;;  %s28_s18 = int_to_ptr.vmem [resolvable:$true] %s27_s18 }
   0x7   :  { %33 = dma.hbm_to_vmem [thread:$0]  %s26_s16, 2560, %s28_s18, [#allocation6], %s216_s19, %s216_s19, %s217_s20  }
   0x8   :  { %208 = dma.done.wait [#allocation3], 256  }
   0x9   :  { %209 = vsyncadd [#allocation3], 4294967040 }
   0xa   :  { %210 = dma.done.wait [#allocation6], 2560  }
   0xb   :  { %211 = vsyncadd [#allocation6], 4294964736  ;;  %v59_v0 = vld [vmem:[#allocation5 + $0x78] sm:$0xff]  ;;  %v58_v1 = vld [vmem:[#allocation5 + $0x70] sm:$0xff]  ;;  %vm64_vm0 = vcmask 261120   ;;  %s218_s0 = smov [#allocation7]  }
   0xc   :  { %68 = vmatpush.msra.mxu0 %v59_v0  ;;  %v57_v2 = vld [vmem:[#allocation5 + $0x68] sm:$0xff]  ;;  %v56_v3 = vld [vmem:[#allocation5 + $0x60] sm:$0xff]  ;;  %v63_v4 = vld [vmem:[#allocation5 + $0x98] sm:$0xff]  ;;  %s115_s1 = sshll.u32 %s218_s0, 4  ;;  %s117_s23 = sshll.u32 %s245_s2, 4  ;;  %s116_s1 = int_to_ptr.vmem [resolvable:$true] %s115_s1  ;;  %s118_s23 = int_to_ptr.hbm [resolvable:$true] %s117_s23 }
   0xd   :  { %100 = vmatpush.msra.mxu1 %v63_v4  ;;  %v62_v5 = vld [vmem:[#allocation5 + $0x90] sm:$0xff]  ;;  %v55_v6 = vld [vmem:[#allocation5 + $0x58] sm:$0xff]  ;;  %v61_v7 = vld [vmem:[#allocation5 + $0x88] sm:$0xff] }
   0xe   :  { %69 = vmatpush.msra.mxu0 %v58_v1  ;;  %v54_v8 = vld [vmem:[#allocation5 + $0x50] sm:$0xff]  ;;  %v60_v9 = vld [vmem:[#allocation5 + $0x80] sm:$0xff]  ;;  %v43_v10 = vld [vmem:[#allocation2 + $0x8] sm:$0xff] }
   0xf   :  { %101 = vmatpush.msra.mxu1 %v62_v5  ;;  %v53_v11 = vld [vmem:[#allocation5 + $0x48] sm:$0xff]  ;;  %v52_v12 = vld [vmem:[#allocation5 + $0x40] sm:$0xff]  ;;  %v51_v13 = vld [vmem:[#allocation5 + $0x38] sm:$0xff] }
  0x10   :  { %70 = vmatpush.msra.mxu0 %v57_v2  ;;  %v50_v14 = vld [vmem:[#allocation5 + $0x30] sm:$0xff]  ;;  %v49_v15 = vld [vmem:[#allocation5 + $0x28] sm:$0xff]  ;;  %v48_v16 = vld [vmem:[#allocation5 + $0x20] sm:$0xff] }
  0x11   :  { %102 = vmatpush.msra.mxu1 %v61_v7  ;;  %v47_v17 = vld [vmem:[#allocation5 + $0x18] sm:$0xff]  ;;  %v46_v18 = vld [vmem:[#allocation5 + $0x10] sm:$0xff]  ;;  %v45_v19 = vld [vmem:[#allocation5 + $0x8] sm:$0xff] }
  0x12   :  { %71 = vmatpush.msra.mxu0 %v56_v3  ;;  %v44_v20 = vld [vmem:[#allocation5] sm:$0xff]  ;;  %v42_v21 = vld [vmem:[#allocation2] sm:$0xff] }
  0x13   :  { %103 = vmatpush.msra.mxu1 %v60_v9 }
  0x14   :  { %72 = vmatpush.msra.mxu0 %v55_v6  ;;  %128 = vmatmul.msk.f32.vlgmr.msra.gmra.mxu1 %vm64_vm0, %v43_v10 }
  0x16   :  { %73 = vmatpush.msra.mxu0 %v54_v8 }
  0x18   :  { %74 = vmatpush.msra.mxu0 %v53_v11 }
  0x1a   :  { %75 = vmatpush.msra.mxu0 %v52_v12 }
  0x1c   :  { %76 = vmatpush.msra.mxu0 %v51_v13 }
  0x1e   :  { %77 = vmatpush.msra.mxu0 %v50_v14 }
  0x20   :  { %78 = vmatpush.msra.mxu0 %v49_v15 }
  0x22   :  { %79 = vmatpush.msra.mxu0 %v48_v16 }
  0x24   :  { %80 = vmatpush.msra.mxu0 %v47_v17 }
  0x26   :  { %81 = vmatpush.msra.mxu0 %v46_v18 }
  0x28   :  { %82 = vmatpush.msra.mxu0 %v45_v19 }
  0x2a   :  { %83 = vmatpush.msra.mxu0 %v44_v20 }
  0x2b   :  { %84 = vmatmul.f32.vlgmr.msra.gmra.mxu0 %v42_v21 }
  0x91   :  { %v105_v22 = vpop.f32.mrf.mxu1 }
  0xa8   :  { %v85_v23 = vpop.f32.mrf.mxu0 }
  0xa9   :  { %v106_v24 = vadd.f32 %v105_v22, %v85_v23 }
  0xab   :  { %134 = vtanh.f32 %v106_v24 }
  0xb1   :  { %v135_v25 = vpop.eup %134 }
  0xb2   :  { %109 = vst [vmem:[#allocation7] sm:$0xff] %v135_v25 }
  0xb3   :  { %120 = dma.vmem_to_hbm [thread:$0]  %s116_s1, 128, %s118_s23, [#allocation4]  }
  0xb4   :  { %212 = dma.done.wait [#allocation4], 128  }
  0xb5   :  { %213 = vsyncadd [#allocation4], 4294967168 }
  0xb6   :  { %125 = vsyncpa [#allocation3], 1 }
  0xb7   :  { %126 = vsyncpa [#allocation6], 1 }
  0xb8   :  { %127 = vsyncpa [#allocation4], 1 }

</bundles_post_ra>
